<compile_context>
chip_gen: v5e
topology: v5e:2x2
jax: 0.10.0
libtpu: 0.0.40
codegen_flags: <defaults>
</compile_context>

<pallas_src>
import functools
import math

import jax
import jax.numpy as jnp
from jax.experimental import pallas as pl
from jax.experimental.pallas import tpu as pltpu

CUTS = 8       # hidden units of the per-pair 3D MLP filter inside dMaSIFConv
TILE_Q = 128   # query-point tile (lanes of the output block)
TILE_K = 512   # key-point tile (reduction axis); must be a multiple of TILE_Q
# NOTE: sweep TILE_K in {512, 1024, 2048} on v5e/v6e (128 MiB VMEM); keep <=1024 on v7x.


def _round_up(n, m):
    return ((n + m - 1) // m) * m


def _leaky(x, slope):
    return jnp.where(x >= 0.0, x, slope * x)


def _dot_nt(a, b):
    # contract last dims of both operands: (M, K) x (N, K) -> (M, N)
    return jax.lax.dot_general(
        a, b, (((1,), (1,)), ((), ())), preferred_element_type=jnp.float32)


def _group_norm_cm(x, w, b, groups, eps):
    # matches torch.nn.GroupNorm(groups, C) applied to (1, C, N); x is (C, N)
    c = x.shape[0]
    cg = c // groups
    rows = []
    for g in range(groups):                      # static unroll over groups
        xg = x[g * cg:(g + 1) * cg, :]
        mu = jnp.mean(xg)
        var = jnp.mean(jnp.square(xg - mu))
        rows.append((xg - mu) * jax.lax.rsqrt(var + eps))
    return jnp.concatenate(rows, axis=0) * w + b


# ---------------------------------------------------------------------------
# Fused point-wise kernels (channel-major; GroupNorm needs global statistics)
# ---------------------------------------------------------------------------
def _orient_kernel(x_ref, w1_ref, b1_ref, w2_ref, b2_ref, o_ref):
    y = _leaky(jnp.dot(w1_ref[...], x_ref[...],
                       preferred_element_type=jnp.float32) + b1_ref[...], 0.2)
    o_ref[...] = jnp.dot(w2_ref[...], y,
                         preferred_element_type=jnp.float32) + b2_ref[...]


def pallas_orientation_scores(x_t, w1, b1, w2, b2):
    n = x_t.shape[1]
    return pl.pallas_call(
        _orient_kernel,
        out_shape=jax.ShapeDtypeStruct((1, n), jnp.float32),
        compiler_params=pltpu.CompilerParams(vmem_limit_bytes=32 * 1024 * 1024),
    )(x_t, w1, b1, w2, b2)


def _net_in_kernel(x_ref, w1_ref, b1_ref, w2_ref, b2_ref, gw_ref, gb_ref,
                   o_ref, *, groups, eps):
    y = _leaky(jnp.dot(w1_ref[...], x_ref[...],
                       preferred_element_type=jnp.float32) + b1_ref[...], 0.2)
    y = _leaky(jnp.dot(w2_ref[...], y,
                       preferred_element_type=jnp.float32) + b2_ref[...], 0.2)
    o_ref[...] = _group_norm_cm(y, gw_ref[...], gb_ref[...], groups, eps)


def pallas_net_in(x_t, w1, b1, w2, b2, gw, gb, groups=4, eps=1e-5):
    n = x_t.shape[1]
    h = w2.shape[0]
    return pl.pallas_call(
        functools.partial(_net_in_kernel, groups=groups, eps=eps),
        out_shape=jax.ShapeDtypeStruct((h, n), jnp.float32),
        compiler_params=pltpu.CompilerParams(vmem_limit_bytes=32 * 1024 * 1024),
    )(x_t, w1, b1, w2, b2, gw, gb)


def _net_out_kernel(conv_ref, x_ref,
                    ow1_ref, ob1_ref, ow2_ref, ob2_ref, gw_ref, gb_ref,
                    lw1_ref, lb1_ref, lw2_ref, lb2_ref, tw_ref, tb_ref,
                    o_ref, *, groups, eps):
    # dMaSIFConv.net_out + GroupNorm
    y = _leaky(jnp.dot(ow1_ref[...], conv_ref[...],
                       preferred_element_type=jnp.float32) + ob1_ref[...], 0.2)
    y = _leaky(jnp.dot(ow2_ref[...], y,
                       preferred_element_type=jnp.float32) + ob2_ref[...], 0.2)
    y = _group_norm_cm(y, gw_ref[...], gb_ref[...], groups, eps)
    # linear_layers[i]: Linear -> ReLU -> Linear
    y = jnp.maximum(jnp.dot(lw1_ref[...], y,
                            preferred_element_type=jnp.float32) + lb1_ref[...], 0.0)
    y = jnp.dot(lw2_ref[...], y,
                preferred_element_type=jnp.float32) + lb2_ref[...]
    # residual: linear_transform[i](x) + y
    o_ref[...] = (jnp.dot(tw_ref[...], x_ref[...],
                          preferred_element_type=jnp.float32) + tb_ref[...]) + y


def pallas_net_out(conv_t, x_t, ow1, ob1, ow2, ob2, gw, gb,
                   lw1, lb1, lw2, lb2, tw, tb, groups=4, eps=1e-5):
    n = conv_t.shape[1]
    e = lw2.shape[0]
    return pl.pallas_call(
        functools.partial(_net_out_kernel, groups=groups, eps=eps),
        out_shape=jax.ShapeDtypeStruct((e, n), jnp.float32),
        compiler_params=pltpu.CompilerParams(vmem_limit_bytes=32 * 1024 * 1024),
    )(conv_t, x_t, ow1, ob1, ow2, ob2, gw, gb, lw1, lb1, lw2, lb2, tw, tb)


# ---------------------------------------------------------------------------
# load_mesh: weighted pseudo-geodesic steering of tangent frames -> nuv (N, 9)
# grid = (query tiles, key tiles); ex/ey accumulated in VMEM scratch.
#   kgeo  : (8, N_pad)  key slab [p(3); |p|^2; 1; n(3)]        block (8, TK)
#   wj    : (1, N_pad)  orientation scores (0 on padding)       block (1, TK)
#   qgrp  : (N_pad, 32) query coeffs [d2 | xu | xv | ndot] grps block (TQ, 32)
#   frame : (N_pad, 9)  un-steered [n, u, v]                    block (TQ, 9)
# ---------------------------------------------------------------------------
def _load_mesh_kernel(kgeo_ref, wj_ref, qgrp_ref, frame_ref, nuv_ref,
                      ex_ref, ey_ref):
    k = pl.program_id(1)

    @pl.when(k == 0)
    def _():
        ex_ref[...] = jnp.zeros_like(ex_ref)
        ey_ref[...] = jnp.zeros_like(ey_ref)

    kgeo = kgeo_ref[...]          # (8, TK)
    qg = qgrp_ref[...]            # (TQ, 32)
    wj = wj_ref[...]              # (1, TK)

    def pair(g):                  # (TQ, 8) @ (8, TK) -> (TQ, TK) on the MXU
        return jnp.dot(qg[:, 8 * g:8 * (g + 1)], kgeo,
                       preferred_element_type=jnp.float32)

    d2 = jnp.maximum(pair(0), 0.0)       # clamp cancellation noise
    xu = pair(1)
    xv = pair(2)
    ndot = pair(3)

    w = jnp.exp(-d2 * jnp.square(2.0 - ndot)) * wj       # (TQ, TK)
    ex_ref[...] += jnp.sum(w * xu, axis=1, keepdims=True)
    ey_ref[...] += jnp.sum(w * xv, axis=1, keepdims=True)

    @pl.when(k == pl.num_programs(1) - 1)
    def _():
        frame = frame_ref[...]            # (TQ, 9)
        n_i = frame[:, 0:3]
        u_i = frame[:, 3:6]
        v_i = frame[:, 6:9]
        ex = ex_ref[...] + 1e-5
        ey = ey_ref[...] + 1e-5
        new_u = ex * u_i + ey * v_i
        new_v = -ey * u_i + ex * v_i
        nuv_ref[...] = jnp.concatenate([n_i, new_u, new_v], axis=1)


def pallas_load_mesh(kgeo, wj, qgrp, frame0, *, tq=TILE_Q, tk=TILE_K):
    n_pad = kgeo.shape[1]
    grid = (n_pad // tq, n_pad // tk)
    return pl.pallas_call(
        _load_mesh_kernel,
        out_shape=jax.ShapeDtypeStruct((n_pad, 9), jnp.float32),
        grid=grid,
        in_specs=[
            pl.BlockSpec((8, tk), lambda i, k: (0, k)),    # key geometry slab
            pl.BlockSpec((1, tk), lambda i, k: (0, k)),    # score row
            pl.BlockSpec((tq, 32), lambda i, k: (i, 0)),   # query coefficient groups
            pl.BlockSpec((tq, 9), lambda i, k: (i, 0)),    # un-steered frames
        ],
        out_specs=pl.BlockSpec((tq, 9), lambda i, k: (i, 0)),
        scratch_shapes=[pltpu.VMEM((tq, 1), jnp.float32),
                        pltpu.VMEM((tq, 1), jnp.float32)],
        compiler_params=pltpu.CompilerParams(
            dimension_semantics=("parallel", "arbitrary"),
            vmem_limit_bytes=32 * 1024 * 1024),
    )(kgeo, wj, qgrp, frame0)


# ---------------------------------------------------------------------------
# dMaSIFConv quasi-geodesic pairwise convolution (hot N x N path), channel-major.
#   out[h,i] = sum_j window_ij * (b2[h] + sum_c a2[h,c]*relu(a1[c].X_ij+b1[c])) * f[h,j]
# All pairwise quantities (d2, ndot, per-cut filter pre-activations) come out of
# standard (TQ,8)@(8,TK) MXU matmuls against the augmented key slab; the feature
# accumulation is 1+CUTS small bf16 matmuls with f32 accumulation into the
# VMEM-resident (H, TQ) output block (no concatenates in the hot loop).
# ---------------------------------------------------------------------------
def _conv_pair_kernel(kgeo_ref, qgeo_ref, qcut_ref, f_ref, a2_ref, b2_ref, o_ref):
    k = pl.program_id(1)

    @pl.when(k == 0)
    def _():
        o_ref[...] = jnp.zeros_like(o_ref)

    kgeo = kgeo_ref[...]          # (8, TK)
    qgeo = qgeo_ref[...]          # (TQ, 16)  [d2 group | ndot group]
    qcut = qcut_ref[...]          # (TQ, 8*CUTS) per-cut affine filter coefficients
    f = f_ref[...]                # (H, TK) normalized features (0 on padding)
    a2 = a2_ref[...]              # (H, CUTS)
    b2 = b2_ref[...]              # (H, 1)

    d2 = jnp.maximum(jnp.dot(qgeo[:, 0:8], kgeo,
                             preferred_element_type=jnp.float32), 0.0)
    ndot = jnp.dot(qgeo[:, 8:16], kgeo, preferred_element_type=jnp.float32)
    window = jnp.exp(-d2 * jnp.square(2.0 - ndot))        # (TQ, TK)
    w_b = window.astype(jnp.bfloat16)

    acc = _dot_nt((f * b2).astype(jnp.bfloat16), w_b)     # (H, TQ)
    for c in range(CUTS):                                 # static unroll
        hpre = jnp.dot(qcut[:, 8 * c:8 * (c + 1)], kgeo,
                       preferred_element_type=jnp.float32)
        m = w_b * jnp.maximum(hpre, 0.0).astype(jnp.bfloat16)
        acc += _dot_nt((f * a2[:, c:c + 1]).astype(jnp.bfloat16), m)

    o_ref[...] += acc


def pallas_conv_pair(kgeo, qgeo, qcut, f_t, a2, b2, *, tq=TILE_Q, tk=TILE_K):
    n_pad = kgeo.shape[1]
    h = f_t.shape[0]
    grid = (n_pad // tq, n_pad // tk)
    return pl.pallas_call(
        _conv_pair_kernel,
        out_shape=jax.ShapeDtypeStruct((h, n_pad), jnp.float32),
        grid=grid,
        in_specs=[
            pl.BlockSpec((8, tk), lambda i, k: (0, k)),          # key geometry slab
            pl.BlockSpec((tq, 16), lambda i, k: (i, 0)),         # query d2/ndot coeffs
            pl.BlockSpec((tq, 8 * CUTS), lambda i, k: (i, 0)),   # query per-cut coeffs
            pl.BlockSpec((h, tk), lambda i, k: (0, k)),          # key features (H, TK)
            pl.BlockSpec((h, CUTS), lambda i, k: (0, 0)),        # A2
            pl.BlockSpec((h, 1), lambda i, k: (0, 0)),           # b2
        ],
        out_specs=pl.BlockSpec((h, tq), lambda i, k: (0, i)),
        compiler_params=pltpu.CompilerParams(
            dimension_semantics=("parallel", "arbitrary"),
            vmem_limit_bytes=32 * 1024 * 1024),
    )(kgeo, qgeo, qcut, f_t, a2, b2)


# ---------------------------------------------------------------------------
# Wrapper-side geometry prep (cheap O(N) layout plumbing, not the hot path)
# ---------------------------------------------------------------------------
def _tangent_vectors(normals):
    x, y, z = normals[:, 0], normals[:, 1], normals[:, 2]
    s = jnp.where(z >= 0.0, 1.0, -1.0)
    a = -1.0 / (s + z)
    b = x * y * a
    u = jnp.stack([1.0 + s * x * x * a, s * b, -s * x], axis=1)
    v = jnp.stack([b, s + y * y * a, -y], axis=1)
    return u, v


def _qgroup(vec3, pts, z1, z3):
    # coefficients against key rows [p(3); |p|^2; 1; n(3)] giving vec3.(x_j - x_i)
    return jnp.concatenate(
        [vec3, z1, -jnp.sum(vec3 * pts, axis=1, keepdims=True), z3], axis=1)


def _d2_group(pts, sq, ones, z3):
    # coefficients giving |x_i|^2 + |x_j|^2 - 2 x_i.x_j
    return jnp.concatenate([-2.0 * pts, ones, sq, z3], axis=1)


def _ndot_group(nrm, z1, z3):
    return jnp.concatenate([z3, z1, z1, nrm], axis=1)


def _key_slab(pts, sq, ones, nrm):
    return jnp.transpose(jnp.concatenate([pts, sq, ones, nrm], axis=1))  # (8, N_pad)


def _build_qcut(a1, b1, nq, uq, vq, pts, z1, z3):
    # per-cut affine filter a1[c].X_ij + b1[c] rewritten as coeffs vs the key slab
    parts = []
    for c in range(CUTS):
        wvec = a1[c, 0] * nq + a1[c, 1] * uq + a1[c, 2] * vq      # (N_pad, 3)
        off = b1[c] - jnp.sum(wvec * pts, axis=1, keepdims=True)  # (N_pad, 1)
        parts.append(jnp.concatenate([wvec, z1, off, z3], axis=1))
    return jnp.concatenate(parts, axis=1)                          # (N_pad, 8*CUTS)


# ---------------------------------------------------------------------------
# Parameter init (deterministic, PyTorch-default-style uniform / dMaSIF filter init)
# Linear weights are stored (out, in) (channel-major), biases (out, 1).
# ---------------------------------------------------------------------------
def init_params(key, in_channels, orientation_units, emb_dims, n_layers):
    h = emb_dims  # dMaSIFConv hidden size == out_channels

    def linear(key, fan_in, fan_out):
        k1, k2 = jax.random.split(key)
        bound = 1.0 / math.sqrt(fan_in)
        w = jax.random.uniform(k1, (fan_out, fan_in), jnp.float32, -bound, bound)
        b = jax.random.uniform(k2, (fan_out, 1), jnp.float32, -bound, bound)
        return w, b

    keys = jax.random.split(key, 2 + n_layers)
    p = {}
    p["os_w1"], p["os_b1"] = linear(keys[0], in_channels, orientation_units)
    p["os_w2"], p["os_b2"] = linear(keys[1], orientation_units, 1)

    layers = []
    for i in range(n_layers):
        cin = in_channels if i == 0 else emb_dims
        lk = jax.random.split(keys[2 + i], 10)
        lp = {}
        lp["in_w1"], lp["in_b1"] = linear(lk[0], cin, h)
        lp["in_w2"], lp["in_b2"] = linear(lk[1], h, h)
        lp["gn_in_w"] = jnp.ones((h, 1), jnp.float32)
        lp["gn_in_b"] = jnp.zeros((h, 1), jnp.float32)
        # 3D MLP filter (dMaSIFConv custom init, deterministic)
        a1 = jax.random.normal(lk[2], (CUTS, 3), jnp.float32)
        b1 = (0.8 * jnp.sqrt(jnp.sum(a1 * a1, axis=1))
              * jax.random.uniform(lk[3], (CUTS,), jnp.float32))
        a2 = jax.random.uniform(lk[4], (h, CUTS), jnp.float32,
                                -1.0 / math.sqrt(CUTS), 1.0 / math.sqrt(CUTS))
        b2 = (0.5 * jnp.sqrt(jnp.sum(a2 * a2, axis=1))
              * jax.random.normal(lk[5], (h,), jnp.float32))
        lp["A1"], lp["b1"] = a1, b1
        lp["A2"], lp["b2"] = a2, b2.reshape(h, 1)
        lp["out_w1"], lp["out_b1"] = linear(lk[6], h, emb_dims)
        lp["out_w2"], lp["out_b2"] = linear(lk[7], emb_dims, emb_dims)
        lp["gn_out_w"] = jnp.ones((emb_dims, 1), jnp.float32)
        lp["gn_out_b"] = jnp.zeros((emb_dims, 1), jnp.float32)
        lp["ll_w1"], lp["ll_b1"] = linear(lk[8], emb_dims, emb_dims)
        lp["ll_w2"], lp["ll_b2"] = linear(lk[9], emb_dims, emb_dims)
        lp["lt_w"], lp["lt_b"] = linear(jax.random.fold_in(keys[2 + i], 12345),
                                        cin, emb_dims)
        layers.append(lp)
    p["layers"] = layers
    return p


# ---------------------------------------------------------------------------
# Full dMaSIFSiteEmbed forward
# ---------------------------------------------------------------------------
def dmasif_site_embed_forward(params, surface_xyz, surface_normals, features,
                              *, radius, n_layers, tq=TILE_Q, tk=TILE_K):
    assert tk % tq == 0
    n = surface_xyz.shape[0]
    n_pad = _round_up(n, tk)
    pad_rows = n_pad - n

    feat_t = jnp.transpose(features)                     # (C_in, N) channel-major

    # orientation_scores: Linear -> LeakyReLU(0.2) -> Linear   (fused, one call)
    scores = pallas_orientation_scores(feat_t, params["os_w1"], params["os_b1"],
                                       params["os_w2"], params["os_b2"])  # (1, N)

    xyz_p = jnp.pad(surface_xyz, ((0, pad_rows), (0, 0)))
    nrm_p = jnp.pad(surface_normals, ((0, pad_rows), (0, 0)))
    scores_p = jnp.pad(scores, ((0, 0), (0, pad_rows)))  # padded keys masked (score 0)

    ones = jnp.ones((n_pad, 1), jnp.float32)
    z1 = jnp.zeros((n_pad, 1), jnp.float32)
    z3 = jnp.zeros((n_pad, 3), jnp.float32)

    # ---- conv.load_mesh: steered local frames nuv = [n, u, v] ----
    pm = xyz_p / radius
    sqm = jnp.sum(pm * pm, axis=1, keepdims=True)
    kgeo_m = _key_slab(pm, sqm, ones, nrm_p)             # (8, N_pad)
    u0, v0 = _tangent_vectors(nrm_p)
    qgrp_m = jnp.concatenate([
        _d2_group(pm, sqm, ones, z3),
        _qgroup(u0, pm, z1, z3),
        _qgroup(v0, pm, z1, z3),
        _ndot_group(nrm_p, z1, z3)], axis=1)             # (N_pad, 32)
    frame0 = jnp.concatenate([nrm_p, u0, v0], axis=1)    # (N_pad, 9)
    nuv_p = pallas_load_mesh(kgeo_m, scores_p, qgrp_m, frame0, tq=tq, tk=tk)

    # ---- layer-invariant conv geometry (dMaSIFConv point scaling) ----
    pc = xyz_p / (math.sqrt(2.0) * radius)
    sqc = jnp.sum(pc * pc, axis=1, keepdims=True)
    kgeo_c = _key_slab(pc, sqc, ones, nrm_p)             # (8, N_pad)
    nq, uq, vq = nuv_p[:, 0:3], nuv_p[:, 3:6], nuv_p[:, 6:9]
    qgeo_c = jnp.concatenate([
        _d2_group(pc, sqc, ones, z3),
        _ndot_group(nrm_p, z1, z3)], axis=1)             # (N_pad, 16)

    x_t = feat_t                                         # (C, N)
    for i in range(n_layers):
        lp = params["layers"][i]
        # dMaSIFConv.net_in + GroupNorm (fused, channel-major)
        f_t = pallas_net_in(x_t, lp["in_w1"], lp["in_b1"], lp["in_w2"], lp["in_b2"],
                            lp["gn_in_w"], lp["gn_in_b"])         # (H, N)
        f_pad = jnp.pad(f_t, ((0, 0), (0, pad_rows)))             # zero cols = no pad contribution
        # per-layer query-side filter coefficients (folds a1.X+b1 into the MXU matmul)
        qcut = _build_qcut(lp["A1"], lp["b1"], nq, uq, vq, pc, z1, z3)
        conv_t = pallas_conv_pair(kgeo_c, qgeo_c, qcut, f_pad,
                                  lp["A2"], lp["b2"], tq=tq, tk=tk)[:, :n]
        # net_out + GroupNorm + linear_layers + residual linear_transform (fused)
        x_t = pallas_net_out(conv_t, x_t,
                             lp["out_w1"], lp["out_b1"], lp["out_w2"], lp["out_b2"],
                             lp["gn_out_w"], lp["gn_out_b"],
                             lp["ll_w1"], lp["ll_b1"], lp["ll_w2"], lp["ll_b2"],
                             lp["lt_w"], lp["lt_b"])
    return jnp.transpose(x_t)                            # (N, emb_dims)


if __name__ == "__main__":
    key = jax.random.PRNGKey(0)
    N = 32
    in_channels = 16
    orientation_units = 16
    emb_dims = 8          # must be a multiple of 4 (GroupNorm groups)
    n_layers = 2
    radius = 9.0

    k_xyz, k_nrm, k_feat, k_par = jax.random.split(key, 4)
    surface_xyz = 10.0 * jax.random.normal(k_xyz, (N, 3), jnp.float32)
    nrm = jax.random.normal(k_nrm, (N, 3), jnp.float32)
    surface_normals = nrm / jnp.linalg.norm(nrm, axis=1, keepdims=True)
    features = jax.random.normal(k_feat, (N, in_channels), jnp.float32)

    params = init_params(k_par, in_channels, orientation_units, emb_dims, n_layers)
    emb = dmasif_site_embed_forward(params, surface_xyz, surface_normals, features,
                                    radius=radius, n_layers=n_layers)
    emb = jax.block_until_ready(emb)
    assert emb.shape == (N, emb_dims)
    assert bool(jnp.all(jnp.isfinite(emb)))
    print("KERNEL_OK")
</pallas_src>

<mosaic_0001>
module attributes {stable_mosaic.version = 11 : i64} {
  func.func @_orient_kernel(%arg0: memref<16x32xf32, #tpu.memory_space<vmem>>, %arg1: memref<16x16xf32, #tpu.memory_space<vmem>>, %arg2: memref<16x1xf32, #tpu.memory_space<vmem>>, %arg3: memref<1x16xf32, #tpu.memory_space<vmem>>, %arg4: memref<1x1xf32, #tpu.memory_space<vmem>>, %arg5: memref<1x32xf32, #tpu.memory_space<vmem>>) attributes {dimension_semantics = [], scalar_prefetch = 0 : i64, scratch_operands = 0 : i64, tpu.core_type = #tpu.core_type<tc>} {
    %c0 = arith.constant 0 : index
    %c0_0 = arith.constant 0 : index
    %0 = vector.load %arg1[%c0, %c0_0] : memref<16x16xf32, #tpu.memory_space<vmem>>, vector<16x16xf32>
    %c0_1 = arith.constant 0 : index
    %c0_2 = arith.constant 0 : index
    %1 = vector.load %arg0[%c0_1, %c0_2] : memref<16x32xf32, #tpu.memory_space<vmem>>, vector<16x32xf32>
    %cst = arith.constant dense<0.000000e+00> : vector<16x32xf32>
    %2 = tpu.matmul %0, %1, %cst {dimension_numbers = #tpu.dot_dimension_numbers<[1], [0], [0], [1], [0, 0, 1, 1], [], []>} : vector<16x16xf32>, vector<16x32xf32>, vector<16x32xf32> -> vector<16x32xf32>
    %c0_3 = arith.constant 0 : index
    %c0_4 = arith.constant 0 : index
    %3 = vector.load %arg2[%c0_3, %c0_4] : memref<16x1xf32, #tpu.memory_space<vmem>>, vector<16x1xf32>
    %4 = vector.broadcast %3 : vector<16x1xf32> to vector<16x32xf32>
    %5 = arith.addf %2, %4 : vector<16x32xf32>
    %cst_5 = arith.constant 0.000000e+00 : f32
    %6 = vector.broadcast %cst_5 : f32 to vector<16x32xf32>
    %7 = arith.cmpf oge, %5, %6 : vector<16x32xf32>
    %cst_6 = arith.constant 2.000000e-01 : f32
    %8 = vector.broadcast %cst_6 : f32 to vector<16x32xf32>
    %9 = arith.mulf %8, %5 : vector<16x32xf32>
    %10 = arith.select %7, %5, %9 : vector<16x32xi1>, vector<16x32xf32>
    %c0_7 = arith.constant 0 : index
    %c0_8 = arith.constant 0 : index
    %11 = vector.load %arg3[%c0_7, %c0_8] : memref<1x16xf32, #tpu.memory_space<vmem>>, vector<1x16xf32>
    %cst_9 = arith.constant dense<0.000000e+00> : vector<1x32xf32>
    %12 = tpu.matmul %11, %10, %cst_9 {dimension_numbers = #tpu.dot_dimension_numbers<[1], [0], [0], [1], [0, 0, 1, 1], [], []>} : vector<1x16xf32>, vector<16x32xf32>, vector<1x32xf32> -> vector<1x32xf32>
    %c0_10 = arith.constant 0 : index
    %c0_11 = arith.constant 0 : index
    %13 = vector.load %arg4[%c0_10, %c0_11] : memref<1x1xf32, #tpu.memory_space<vmem>>, vector<1x1xf32>
    %14 = vector.broadcast %13 : vector<1x1xf32> to vector<1x32xf32>
    %15 = arith.addf %12, %14 : vector<1x32xf32>
    %c0_12 = arith.constant 0 : index
    %c0_13 = arith.constant 0 : index
    %16 = vector.load %arg5[%c0_12, %c0_13] : memref<1x32xf32, #tpu.memory_space<vmem>>, vector<1x32xf32>
    tpu.vector_store %arg5[%c0_12, %c0_13], %15 {strides = array<i32>} : memref<1x32xf32, #tpu.memory_space<vmem>>, vector<1x32xf32>,
    return
  }
}

</mosaic_0001>

<bundles_post_ra>
// kernel: tpu_custom_call.1
= control target key start
LH: loop header
LB: loop body
LE: loop exit
PB: predicated region body
PF: predicated region fallthrough
CT: control target
= control target key end

     0   :  { %s267_s0 = inlined_call_operand.vmem [shape: f32[16,32], index: 0, kind: input, shape index: {}]   ;;  %s268_s1 = inlined_call_operand.hbm [shape: f32[16,16], index: 1, kind: input, shape index: {}]   ;;  %s269_s2 = inlined_call_operand.vmem [shape: f32[16,1], index: 2, kind: input, shape index: {}]   ;;  %s270_s3 = inlined_call_operand.vmem [shape: f32[1,16], index: 3, kind: input, shape index: {}]   ;;  %s271_s4 = inlined_call_operand.<no memory space> [shape: f32[1,1], index: 4, kind: input, shape index: {}]   ;;  %s272_s5 = inlined_call_operand.hbm [shape: f32[1,32], index: 5, kind: output, shape index: {}]  }
   0x1   :  { %v10_v0 = vstv %s271_s4 }
   0x2   :  { %11 = vst [vmem:[#allocation2] sm:$0x1] %v10_v0 }
   0x3   :  { %12 = vsyncpa [#allocation4], 0 }
   0x4   :  { %13 = vsyncpa [#allocation5], 0  ;;  %s20_s22 = sshll.u32 %s268_s1, 4  ;;  %s205_s23 = smov [#allocation3]   ;;  %s21_s22 = int_to_ptr.hbm [resolvable:$true] %s20_s22 }
   0x5   :  { %s22_s24 = sshll.u32 %s205_s23, 4  ;;  %s206_s25 = smov 128   ;;  %s23_s24 = int_to_ptr.vmem [resolvable:$true] %s22_s24 }
   0x6   :  { %s207_s26 = smov 8  }
   0x7   :  { %28 = dma.hbm_to_vmem [thread:$0]  %s21_s22, 256, %s23_s24, [#allocation4], %s206_s25, %s206_s25, %s207_s26  }
   0x8   :  { %201 = dma.done.wait [#allocation4], 256  }
   0x9   :  { %202 = vsyncadd [#allocation4], 4294967040  ;;  %v208_v1 = vmov 0   ;;  %v42_v2 = vld [vmem:[%s267_s0 + $0x8] sm:$0xff]  ;;  %v41_v3 = vld [vmem:[%s267_s0] sm:$0xff]  ;;  %vm55_vm0 = vcmask 130048  }
   0xa   :  { %151 = vset.pattern.permute.xlu0 %v208_v1  ;;  %152 = vset.pattern.permute.xlu1 %v208_v1  ;;  %v39_v4 = vld [vmem:[#allocation3] sm:$0xff]  ;;  %v40_v5 = vld [vmem:[#allocation3 + $0x8] sm:$0xff]  ;;  %v92_v8 = vld [vmem:[#allocation2] sm:$0x1]  ;;  %s131_s12 = sshll.u32 %s272_s5, 4  ;;  %vm122_vm3 = vcmask 253952   ;;  %s132_s12 = int_to_ptr.hbm [resolvable:$true] %s131_s12 }
   0xb   :  { %76 = vmatpush.msra.mxu0 %v42_v2  ;;  %144 = vmatpush.msra.mxu2 %v42_v2  ;;  %v44_v6 = vld [vmem:[%s269_s2 + $0x8] sm:$0xff]  ;;  %v43_v7 = vld [vmem:[%s269_s2] sm:$0xff]  ;;  %s209_s2 = smov [#allocation6]  }
   0xc   :  { %52 = vperm.xlu0 %151, %v44_v6   ;;  %95 = vperm.xlu1 %152, %v92_v8   ;;  %v91_v18 = vld [vmem:[%s270_s3] sm:$0x1]  ;;  %s129_s9 = sshll.u32 %s209_s2, 4  ;;  %s130_s9 = int_to_ptr.vmem [resolvable:$true] %s129_s9 }
   0xd   :  { %77 = vmatpush.msra.mxu0 %v41_v3  ;;  %145 = vmatpush.msra.mxu2 %v41_v3 }
   0xe   :  { %141 = vmatmul.msk.f32.vlgmr.msra.gmra.mxu0 %vm55_vm0, %v39_v4  ;;  %142 = vmatmul.msk.f32.vlgmr.msra.gmra.mxu2 %vm55_vm0, %v40_v5 }
  0x14   :  { %47 = vperm.xlu0 %151, %v43_v7  }
  0x7e   :  { %v53_v9 = vpop.permute.xlu0 %52  ;;  %v96_v20 = vpop.permute.xlu1 %95 }
  0x7f   :  { %v98_v21 = vperm.slane %v96_v20, 0 }
  0x86   :  { %v48_v10 = vpop.permute.xlu0 %47 }
  0x8b   :  { %v79_v11 = vpop.f32.mrf.mxu0 }
  0x8c   :  { %v80_v12 = vadd.f32 %v79_v11, %v48_v10 }
  0x8e   :  { %v87_v16 = vmul.f32 0.2, %v80_v12  ;;  %vm85_vm2 = vcmp.ge.f32.partialorder %v80_v12, 0.0 }
  0x90   :  { %v89_v19 = vsel %vm85_vm2, %v80_v12, %v87_v16 }
  0x91   :  { %v82_v13 = vpop.f32.mrf.mxu2 }
  0x92   :  { %v83_v14 = vadd.f32 %v82_v13, %v53_v9 }
  0x94   :  { %vm86_vm1 = vcmp.ge.f32.partialorder %v83_v14, 0.0  ;;  %v88_v15 = vmul.f32 0.2, %v83_v14 }
  0x96   :  { %v90_v17 = vsel %vm86_vm1, %v83_v14, %v88_v15 }
  0x97   :  { %116 = vmatpush.msra.mxu1 %v90_v17 }
  0x99   :  { %117 = vmatpush.msra.mxu1 %v89_v19 }
  0x9a   :  { %143 = vmatmul.msk.f32.vlgmr.msra.gmra.mxu1 %vm55_vm0, %v91_v18 }
 0x117   :  { %v119_v22 = vpop.f32.mrf.mxu1 }
 0x118   :  { %v120_v23 = vadd.f32 %v119_v22, %v98_v21 }
 0x11a   :  { %123 = vst.msk [vmem:[#allocation6] sm:$0x1] %vm122_vm3, %v120_v23 }
 0x11b   :  { %134 = dma.vmem_to_hbm [thread:$0]  %s130_s9, 16, %s132_s12, [#allocation5]  }
 0x11c   :  { %203 = dma.done.wait [#allocation5], 16  }
 0x11d   :  { %204 = vsyncadd [#allocation5], 4294967280 }
 0x11e   :  { %139 = vsyncpa [#allocation4], 1 }
 0x11f   :  { %140 = vsyncpa [#allocation5], 1 }

</bundles_post_ra>
